<compile_context>
chip_gen: v7x
topology: tpu7x:2x2x1
jax: 0.10.0
libtpu: 0.0.40
codegen_flags: <defaults>
</compile_context>

<pallas_src>
import functools

import jax
import jax.numpy as jnp
from jax.experimental import pallas as pl
from jax.experimental.pallas import tpu as pltpu

_EPS = 1e-6  # PyTorch pairwise_distance eps, added to the difference before the norm


def _round_up(x: int, m: int) -> int:
    return ((x + m - 1) // m) * m


def _triplet_kernel(a_ref, p_ref, n_ref, out_ref, *, margin: float, batch: int,
                    tile_b: int, mask_last: bool):
    # One (TB, D) tile per grid step; all math in f32 regardless of input dtype.
    a = a_ref[...].astype(jnp.float32)
    p = p_ref[...].astype(jnp.float32)
    n = n_ref[...].astype(jnp.float32)

    diff_ap = a - p + _EPS
    diff_an = a - n + _EPS

    # p=2 distances per sample; keep reductions 2-D -> (TB, 1), one value per sublane.
    d_ap = jnp.sqrt(jnp.sum(diff_ap * diff_ap, axis=-1, keepdims=True))
    d_an = jnp.sqrt(jnp.sum(diff_an * diff_an, axis=-1, keepdims=True))

    losses = jnp.maximum(d_ap - d_an + margin, 0.0)  # (TB, 1)

    if mask_last:
        last = pl.num_programs(0) - 1

        @pl.when(pl.program_id(0) == last)
        def _():
            # Rows past the true batch read padded/undefined data; the select keeps
            # them at 0.0 even if the garbage produced Inf/NaN upstream.
            row = (pl.program_id(0) * tile_b
                   + jax.lax.broadcasted_iota(jnp.int32, (tile_b, 1), 0))
            out_ref[0, 0] = jnp.sum(jnp.where(row < batch, losses, 0.0))

        @pl.when(pl.program_id(0) != last)
        def _():
            out_ref[0, 0] = jnp.sum(losses)
    else:
        # Common full-tile path: no iota / select filler at all.
        out_ref[0, 0] = jnp.sum(losses)


def triplet_loss(anchor, positive, negative, margin: float = 0.5):
    assert anchor.shape == positive.shape == negative.shape
    B, D = anchor.shape
    itemsize = jnp.dtype(anchor.dtype).itemsize

    # Sublane packing: 8 rows for f32, 16 for bf16, 32 for 8-bit dtypes.
    sub = max(8, 32 // itemsize)

    # Generation-aware VMEM budget.  v5e/v6e have 128 MiB physical VMEM per TC,
    # v7x only 64 MiB (and 2 TensorCores per chip).
    vmem_cap = 128 * 1024 * 1024
    try:
        vmem_cap = int(pltpu.get_tpu_info().vmem_capacity_bytes)
    except Exception:  # pragma: no cover - fall back to conservative defaults
        pass
    if vmem_cap >= 128 * 1024 * 1024:
        budget = 48 * 1024 * 1024
        vmem_limit = 64 * 1024 * 1024
        multi_core = False          # v5e / v6e: 1 TC per chip
    else:
        budget = 24 * 1024 * 1024
        vmem_limit = 32 * 1024 * 1024
        multi_core = True           # v7x: 2 TCs per chip, 64 MiB VMEM each

    # Per-row VMEM footprint: 3 input streams x 2 pipeline buffers at the input
    # dtype, plus headroom for f32 intermediates (upcasts + diffs) so bf16 inputs
    # don't OOM when the tile is scaled up.
    bytes_per_row = 3 * 2 * D * itemsize + 6 * D * 4
    max_tb = max(sub, ((budget // bytes_per_row) // sub) * sub)

    # Big row tiles amortize the ~0.35 us per-step pipeline overhead; 8192 cap
    # (instead of the old 1024) keeps the working set sane for tiny D.
    tb = min(8192, max_tb, _round_up(B, sub))
    if multi_core and B > sub:
        # Guarantee >= 2 tiles on v7x so both TensorCores (and their DMA queues
        # toward the 3.2 TB/s HBM) get work under dimension_semantics="parallel".
        tb = min(tb, _round_up(pl.cdiv(B, 2), sub))
    num_tiles = pl.cdiv(B, tb)
    mask_last = (B % tb) != 0

    kernel = functools.partial(_triplet_kernel, margin=float(margin), batch=B,
                               tile_b=tb, mask_last=mask_last)

    cost = pl.CostEstimate(
        flops=8 * B * D,                                   # 2 x (sub, +eps, mul, sum)
        transcendentals=2 * B,                             # 2 sqrts per sample
        bytes_accessed=3 * B * D * itemsize + num_tiles * 4,
    )

    partials = pl.pallas_call(
        kernel,
        out_shape=jax.ShapeDtypeStruct((num_tiles, 1), jnp.float32),
        grid=(num_tiles,),
        in_specs=[
            pl.BlockSpec((tb, D), lambda i: (i, 0)),  # anchor
            pl.BlockSpec((tb, D), lambda i: (i, 0)),  # positive
            pl.BlockSpec((tb, D), lambda i: (i, 0)),  # negative
        ],
        out_specs=pl.BlockSpec((1, 1), lambda i: (i, 0),
                               memory_space=pltpu.MemorySpace.SMEM),
        compiler_params=pltpu.CompilerParams(
            dimension_semantics=("parallel",),   # tiles shard across TCs on v7x
            vmem_limit_bytes=vmem_limit,         # explicit (v5e default is only 16 MiB)
        ),
        cost_estimate=cost,
    )(anchor, positive, negative)

    # reduction='mean' over the true batch size.
    return jnp.sum(partials) * (1.0 / B)


if __name__ == "__main__":
    key = jax.random.PRNGKey(0)
    k_a, k_p, k_n = jax.random.split(key, 3)

    B, D = 16, 128  # small facenet-like embedding batch
    anchor = jax.random.normal(k_a, (B, D), dtype=jnp.float32)
    positive = jax.random.normal(k_p, (B, D), dtype=jnp.float32)
    negative = jax.random.normal(k_n, (B, D), dtype=jnp.float32)

    loss = triplet_loss(anchor, positive, negative, margin=0.5)
    jax.block_until_ready(loss)

    # Pure-JAX reference (same math as torch.nn.TripletMarginLoss, p=2, eps=1e-6).
    d_ap = jnp.sqrt(jnp.sum((anchor - positive + _EPS) ** 2, axis=-1))
    d_an = jnp.sqrt(jnp.sum((anchor - negative + _EPS) ** 2, axis=-1))
    ref = jnp.mean(jnp.maximum(d_ap - d_an + 0.5, 0.0))
    assert jnp.allclose(loss, ref, rtol=1e-5, atol=1e-5), (loss, ref)

    print("KERNEL_OK")
</pallas_src>

<mosaic_0001>
module attributes {stable_mosaic.version = 11 : i64} {
  func.func @_triplet_kernel(%arg0: i32, %arg1: memref<16x128xf32, #tpu.memory_space<vmem>>, %arg2: memref<16x128xf32, #tpu.memory_space<vmem>>, %arg3: memref<16x128xf32, #tpu.memory_space<vmem>>, %arg4: memref<1x1xf32, #tpu.memory_space<smem>>) attributes {dimension_semantics = [#tpu.dimension_semantics<parallel>], iteration_bounds = array<i64: 1>, scalar_prefetch = 0 : i64, scratch_operands = 0 : i64, tpu.core_type = #tpu.core_type<tc>, window_params = [{transform_indices = @transform_0, window_bounds = array<i64: 16, 128>}, {transform_indices = @transform_1, window_bounds = array<i64: 16, 128>}, {transform_indices = @transform_2, window_bounds = array<i64: 16, 128>}, {transform_indices = @transform_3, window_bounds = array<i64: 1, 1>}]} {
    %c0 = arith.constant 0 : index
    %c0_0 = arith.constant 0 : index
    %0 = vector.load %arg1[%c0, %c0_0] : memref<16x128xf32, #tpu.memory_space<vmem>>, vector<16x128xf32>
    %c0_1 = arith.constant 0 : index
    %c0_2 = arith.constant 0 : index
    %1 = vector.load %arg2[%c0_1, %c0_2] : memref<16x128xf32, #tpu.memory_space<vmem>>, vector<16x128xf32>
    %c0_3 = arith.constant 0 : index
    %c0_4 = arith.constant 0 : index
    %2 = vector.load %arg3[%c0_3, %c0_4] : memref<16x128xf32, #tpu.memory_space<vmem>>, vector<16x128xf32>
    %3 = arith.subf %0, %1 : vector<16x128xf32>
    %cst = arith.constant 9.99999997E-7 : f32
    %4 = vector.broadcast %cst : f32 to vector<16x128xf32>
    %5 = arith.addf %3, %4 : vector<16x128xf32>
    %6 = arith.subf %0, %2 : vector<16x128xf32>
    %cst_5 = arith.constant 9.99999997E-7 : f32
    %7 = vector.broadcast %cst_5 : f32 to vector<16x128xf32>
    %8 = arith.addf %6, %7 : vector<16x128xf32>
    %9 = arith.mulf %5, %5 : vector<16x128xf32>
    %cst_6 = arith.constant dense<0.000000e+00> : vector<16xf32>
    %10 = vector.multi_reduction <add>, %9, %cst_6 [1] : vector<16x128xf32> to vector<16xf32>
    %11 = vector.shape_cast %10 : vector<16xf32> to vector<16x1xf32>
    %12 = math.sqrt %11 : vector<16x1xf32>
    %13 = arith.mulf %8, %8 : vector<16x128xf32>
    %cst_7 = arith.constant dense<0.000000e+00> : vector<16xf32>
    %14 = vector.multi_reduction <add>, %13, %cst_7 [1] : vector<16x128xf32> to vector<16xf32>
    %15 = vector.shape_cast %14 : vector<16xf32> to vector<16x1xf32>
    %16 = math.sqrt %15 : vector<16x1xf32>
    %17 = arith.subf %12, %16 : vector<16x1xf32>
    %cst_8 = arith.constant 5.000000e-01 : f32
    %18 = vector.broadcast %cst_8 : f32 to vector<16x1xf32>
    %19 = arith.addf %17, %18 : vector<16x1xf32>
    %cst_9 = arith.constant 0.000000e+00 : f32
    %20 = vector.broadcast %cst_9 : f32 to vector<16x1xf32>
    %21 = arith.maximumf %19, %20 : vector<16x1xf32>
    %22 = vector.shape_cast %21 : vector<16x1xf32> to vector<1x16x1xf32>
    %cst_10 = arith.constant dense<0.000000e+00> : vector<1xf32>
    %23 = vector.multi_reduction <add>, %22, %cst_10 [1, 2] : vector<1x16x1xf32> to vector<1xf32>
    %24 = vector.shape_cast %23 : vector<1xf32> to vector<1x1x1xf32>
    %25 = vector.extract %24[0, 0, 0] : f32 from vector<1x1x1xf32>
    %c0_11 = arith.constant 0 : index
    %c0_12 = arith.constant 0 : index
    %26 = memref.load %arg4[%c0_11, %c0_12] : memref<1x1xf32, #tpu.memory_space<smem>>
    memref.store %25, %arg4[%c0_11, %c0_12] : memref<1x1xf32, #tpu.memory_space<smem>>
    return
  }
  func.func @transform_0(%arg0: i32) -> (i32, i32) {
    %c0_i32 = arith.constant 0 : i32
    %c0_i32_0 = arith.constant 0 : i32
    return %arg0, %c0_i32 : i32, i32
  }
  func.func @transform_1(%arg0: i32) -> (i32, i32) {
    %c0_i32 = arith.constant 0 : i32
    %c0_i32_0 = arith.constant 0 : i32
    return %arg0, %c0_i32 : i32, i32
  }
  func.func @transform_2(%arg0: i32) -> (i32, i32) {
    %c0_i32 = arith.constant 0 : i32
    %c0_i32_0 = arith.constant 0 : i32
    return %arg0, %c0_i32 : i32, i32
  }
  func.func @transform_3(%arg0: i32) -> (i32, i32) {
    %c0_i32 = arith.constant 0 : i32
    %c0_i32_0 = arith.constant 0 : i32
    return %arg0, %c0_i32 : i32, i32
  }
}

</mosaic_0001>

<bundles_post_ra>
// kernel: tpu_custom_call.1
= control target key start
LH: loop header
LB: loop body
LE: loop exit
PB: predicated region body
PF: predicated region fallthrough
CT: control target
= control target key end

     0   :  { %8 = vsyncpa [#allocation3], 0  ;;  %s334_s0 = inlined_call_operand.hbm [shape: f32[16,128], index: 0, kind: input, shape index: {}]   ;;  %s335_s1 = inlined_call_operand.hbm [shape: f32[16,128], index: 1, kind: input, shape index: {}]   ;;  %s336_s2 = inlined_call_operand.hbm [shape: f32[16,128], index: 2, kind: input, shape index: {}]   ;;  %s337_s3 = inlined_call_operand.hbm [shape: f32[1,1], index: 3, kind: output, shape index: {}]  }
   0x1   :  { %9 = vsyncpa [#allocation6], 0 }
   0x2   :  { %10 = vsyncpa [#allocation4], 0  ;;  %s244_s12 = smov [#allocation5]   ;;  %s245_s14 = smov [#allocation2]  }
   0x3   :  { %s28_s13 = sshll.u32 %s244_s12, 4  ;;  %s16_s15 = sshll.u32 %s245_s14, 4  ;;  %s29_s13 = int_to_ptr.vmem [resolvable:$true] %s28_s13  ;;  %s270_s15 = int_to_ptr.vmem [resolvable:$true] %s16_s15 }
   0x4   :  { %s162_s18 = scalar_lea.hbm %s335_s1, 256 }
   0x5   :  { %p163_p0 = scmp.ne.s32.totalorder %s335_s1, %s162_s18  ;;  %p166_p1 = scmp.lt.u32.totalorder %s162_s18, %s335_s1 }
   0x7   :  { %p168_p2 = pnand %p166_p1, %p163_p0 }
   0x9   :  { %171 = shalt.err (!%p168_p2)
}
   0xa   :  { %s172_s23 = scalar_lea.vmem %s29_s13, 256  ;;  %p177_p4 = scmp.lt.s32.totalorder %s29_s13, %s29_s13 }
   0xb   :  { %p173_p3 = scmp.ne.s32.totalorder %s29_s13, %s172_s23  ;;  %p178_p5 = scmp.lt.s32.totalorder %s172_s23, %s172_s23 }
   0xd   :  { %p179_p6 = por %p178_p5, %p177_p4 }
   0xf   :  { %p180_p7 = pnand %p179_p6, %p173_p3 }
  0x11   :  { %183 = shalt.err (!%p180_p7)
}
  0x12   :  { %s246_s24 = smov 128   ;;  %s247_s25 = smov 8  }
  0x13   :  { %34 = dma.hbm_to_vmem [thread:$0]  %s335_s1, 256, %s29_s13, [#allocation6], %s246_s24, %s246_s24, %s247_s25  }
  0x14   :  { %s184_s30 = scalar_lea.hbm %s334_s0, 256 }
  0x15   :  { %p185_p8 = scmp.ne.s32.totalorder %s334_s0, %s184_s30  ;;  %p188_p9 = scmp.lt.u32.totalorder %s184_s30, %s334_s0 }
  0x17   :  { %p190_p10 = pnand %p188_p9, %p185_p8 }
  0x19   :  { %193 = shalt.err (!%p190_p10)
}
  0x1a   :  { %s194_s8 = scalar_lea.vmem %s270_s15, 256  ;;  %p199_p12 = scmp.lt.s32.totalorder %s270_s15, %s270_s15 }
  0x1b   :  { %p195_p11 = scmp.ne.s32.totalorder %s270_s15, %s194_s8  ;;  %p200_p13 = scmp.lt.s32.totalorder %s194_s8, %s194_s8 }
  0x1d   :  { %p201_p0 = por %p200_p13, %p199_p12 }
  0x1f   :  { %p202_p1 = pnand %p201_p0, %p195_p11 }
  0x21   :  { %205 = shalt.err (!%p202_p1)
}
  0x22   :  { %22 = dma.hbm_to_vmem [thread:$0]  %s334_s0, 256, %s270_s15, [#allocation3], %s246_s24, %s246_s24, %s247_s25  }
  0x23   :  { %s248_s10 = smov [#allocation7]   ;;  %s206_s14 = scalar_lea.hbm %s336_s2, 256 }
  0x24   :  { %s40_s11 = sshll.u32 %s248_s10, 4  ;;  %p207_p2 = scmp.ne.s32.totalorder %s336_s2, %s206_s14  ;;  %s41_s11 = int_to_ptr.vmem [resolvable:$true] %s40_s11 }
  0x25   :  { %p210_p3 = scmp.lt.u32.totalorder %s206_s14, %s336_s2 }
  0x27   :  { %p212_p4 = pnand %p210_p3, %p207_p2 }
  0x29   :  { %215 = shalt.err (!%p212_p4)
}
  0x2a   :  { %s216_s20 = scalar_lea.vmem %s41_s11, 256  ;;  %p221_p6 = scmp.lt.s32.totalorder %s41_s11, %s41_s11 }
  0x2b   :  { %p217_p5 = scmp.ne.s32.totalorder %s41_s11, %s216_s20  ;;  %p222_p7 = scmp.lt.s32.totalorder %s216_s20, %s216_s20 }
  0x2d   :  { %p223_p8 = por %p222_p7, %p221_p6 }
  0x2f   :  { %p224_p9 = pnand %p223_p8, %p217_p5 }
  0x31   :  { %227 = shalt.err (!%p224_p9)
}
  0x32   :  { %46 = dma.hbm_to_vmem [thread:$0]  %s336_s2, 256, %s41_s11, [#allocation6], %s246_s24, %s246_s24, %s247_s25  }
  0x33   :  { %238 = dma.done.wait [#allocation3], 256  }
  0x34   :  { %239 = vsyncadd [#allocation3], 4294967040 }
  0x35   :  { %240 = dma.done.wait [#allocation6], 512  }
  0x36   :  { %241 = vsyncadd [#allocation6], 4294966784  ;;  %v56_v0 = vld [vmem:[#allocation2] sm:$0xff]  ;;  %v58_v2 = vld [vmem:[#allocation5] sm:$0xff]  ;;  %vm116_vm8 = vcmask 7168   ;;  %s228_s23 = scalar_lea.hbm %s337_s3, 16 }
  0x37   :  { %v60_v1 = vld [vmem:[#allocation7] sm:$0xff]  ;;  %v62_v4 = vsub.f32 %v56_v0, %v58_v2  ;;  %v57_v5 = vld [vmem:[#allocation2 + $0x8] sm:$0xff]  ;;  %v59_v7 = vld [vmem:[#allocation5 + $0x8] sm:$0xff]  ;;  %p229_p10 = scmp.ne.s32.totalorder %s337_s3, %s228_s23  ;;  %p232_p11 = scmp.lt.u32.totalorder %s228_s23, %s337_s3 }
  0x38   :  { %v66_v3 = vsub.f32 %v56_v0, %v60_v1  ;;  %v61_v6 = vld [vmem:[#allocation7 + $0x8] sm:$0xff]  ;;  %v63_v9 = vsub.f32 %v57_v5, %v59_v7 }
  0x39   :  { %v67_v8 = vsub.f32 %v57_v5, %v61_v6  ;;  %v64_v11 = vadd.f32 1e-06, %v62_v4  ;;  %p234_p12 = pnand %p232_p11, %p229_p10 }
  0x3a   :  { %v68_v10 = vadd.f32 1e-06, %v66_v3  ;;  %v65_v13 = vadd.f32 1e-06, %v63_v9 }
  0x3b   :  { %v69_v12 = vadd.f32 1e-06, %v67_v8  ;;  %v70_v15 = vmul.f32 %v64_v11, %v64_v11 }
  0x3c   :  { %v90_v14 = vmul.f32 %v68_v10, %v68_v10  ;;  %v71_v17 = vmul.f32 %v65_v13, %v65_v13 }
  0x3d   :  { %72 = vadd.xlane.f32.xlu0 %v70_v15  ;;  %v91_v16 = vmul.f32 %v69_v12, %v69_v12 }
  0x3e   :  { %92 = vadd.xlane.f32.xlu1 %v90_v14 }
  0x41   :  { %74 = vadd.xlane.f32.xlu0 %v71_v17 }
  0x42   :  { %94 = vadd.xlane.f32.xlu1 %v91_v16 }
  0xca   :  { %v73_v19 = vpop.xlane.xlu0 %72 }
  0xcb   :  { %v93_v18 = vpop.xlane.xlu1 %92  ;;  %vm78_vm1 = vcmp.eq.f32.partialorder %v73_v19, inf  ;;  %v81_v27 = vand.u32 2147483648, %v73_v19  ;;  %vm80_vm3 = vcmp.eq.f32.partialorder %v73_v19, 0.0 }
  0xcc   :  { %154 = vrsqrt.f32 %v93_v18  ;;  %vm98_vm0 = vcmp.eq.f32.partialorder %v93_v18, inf  ;;  %v101_v26 = vand.u32 2147483648, %v93_v18  ;;  %vm100_vm2 = vcmp.eq.f32.partialorder %v93_v18, 0.0 }
  0xcd   :  { %156 = vrsqrt.f32 %v73_v19 }
  0xce   :  { %v75_v21 = vpop.xlane.xlu0 %74 }
  0xcf   :  { %v95_v20 = vpop.xlane.xlu1 %94  ;;  %vm85_vm6 = vcmp.eq.f32.partialorder %v75_v21, inf  ;;  %v88_v39 = vand.u32 2147483648, %v75_v21  ;;  %vm87_vm7 = vcmp.eq.f32.partialorder %v75_v21, 0.0 }
  0xd0   :  { %158 = vrsqrt.f32 %v95_v20  ;;  %vm105_vm4 = vcmp.eq.f32.partialorder %v95_v20, inf  ;;  %v108_v35 = vand.u32 2147483648, %v95_v20  ;;  %vm107_vm5 = vcmp.eq.f32.partialorder %v95_v20, 0.0 }
  0xd1   :  { %160 = vrsqrt.f32 %v75_v21 }
  0xd6   :  { %v155_v22 = vpop.eup %154 }
  0xd7   :  { %v157_v23 = vpop.eup %156  ;;  %v97_v24 = vmul.f32 %v155_v22, %v93_v18 }
  0xd8   :  { %v77_v25 = vmul.f32 %v157_v23, %v73_v19 }
  0xd9   :  { %v99_v28 = vsel %vm98_vm0, %v93_v18, %v97_v24 }
  0xda   :  { %v159_v29 = vpop.eup %158  ;;  %v79_v30 = vsel %vm78_vm1, %v73_v19, %v77_v25  ;;  %v102_v31 = vsel %vm100_vm2, %v101_v26, %v99_v28 }
  0xdb   :  { %v161_v32 = vpop.eup %160  ;;  %v104_v33 = vmul.f32 %v159_v29, %v95_v20  ;;  %v82_v34 = vsel %vm80_vm3, %v81_v27, %v79_v30 }
  0xdc   :  { %v84_v36 = vmul.f32 %v161_v32, %v75_v21  ;;  %v110_v37 = vsub.f32 %v82_v34, %v102_v31 }
  0xdd   :  { %v106_v38 = vsel %vm105_vm4, %v95_v20, %v104_v33 }
  0xde   :  { %v86_v40 = vsel %vm85_vm6, %v75_v21, %v84_v36  ;;  %v109_v41 = vsel %vm107_vm5, %v108_v35, %v106_v38  ;;  %v112_v42 = vadd.f32 0.5, %v110_v37 }
  0xdf   :  { %v89_v43 = vsel %vm87_vm7, %v88_v39, %v86_v40 }
  0xe0   :  { %v111_v44 = vsub.f32 %v89_v43, %v109_v41  ;;  %v114_v46 = vmax.f32 %v112_v42, 0.0 }
  0xe2   :  { %v113_v45 = vadd.f32 0.5, %v111_v44  ;;  %v117_v48 = vsel %vm116_vm8, %v114_v46, 0.0 }
  0xe4   :  { %v115_v47 = vmax.f32 %v113_v45, 0.0 }
  0xe6   :  { %v118_v49 = vsel %vm116_vm8, %v115_v47, 0.0 }
  0xe7   :  { %v119_v50 = vadd.f32 %v118_v49, %v117_v48 }
  0xe9   :  { %120 = vadd.xlane.f32.xlu0 %v119_v50 }
 0x176   :  { %v121_v51 = vpop.xlane.xlu0 %120 }
 0x177   :  { %v122_v52 = vrot.slane %v121_v51, 4 }
 0x179   :  { %v123_v53 = vadd.f32 %v122_v52, %v121_v51 }
 0x17b   :  { %v124_v54 = vrot.slane %v123_v53, 2 }
 0x17d   :  { %v125_v55 = vadd.f32 %v124_v54, %v123_v53 }
 0x17f   :  { %v126_v56 = vrot.slane %v125_v55, 1 }
 0x181   :  { %v127_v57 = vadd.f32 %v126_v56, %v125_v55 }
 0x183   :  { %146 = vpush %v127_v57 }
 0x1b4   :  { %s147_s2 = spop %146 }
 0x1b5   :  { %130 = sst [smem:[#allocation8]] %s147_s2 }
 0x1b6   :  { %237 = shalt.err (!%p234_p12)
}
 0x1b7   :  { %s249_s28 = smov [#allocation8]  }
 0x1b8   :  { %138 = dma.smem_to_hbm %s249_s28, 16, %s337_s3, [#allocation4]  }
 0x1b9   :  { %242 = dma.done.wait [#allocation4], 16  }
 0x1ba   :  { %243 = vsyncadd [#allocation4], 4294967280 }
 0x1bb   :  { %142 = sfence }
 0x1bc   :  { %143 = vsyncpa [#allocation3], 1 }
 0x1bd   :  { %144 = vsyncpa [#allocation6], 1 }
 0x1be   :  { %145 = vsyncpa [#allocation4], 1 }

</bundles_post_ra>
